<compile_context>
chip_gen: v7x
topology: tpu7x:2x2x1
jax: 0.10.0
libtpu: 0.0.40
codegen_flags: <defaults>
</compile_context>

<pallas_src>
import functools

import jax
import jax.numpy as jnp
from jax.experimental import pallas as pl
from jax.experimental.pallas import tpu as pltpu


# ----------------------------------------------------------------------------
# Activation table (matches the PyTorch af_list)
# ----------------------------------------------------------------------------
def _apply_act(x, act_fun):
    if act_fun == 0:
        return jnp.tanh(x)
    elif act_fun == 1:
        return jax.nn.sigmoid(x)
    elif act_fun == 2:
        return jnp.maximum(x, 0.0)
    elif act_fun == 3:
        return jnp.sin(x)
    else:
        raise ValueError(f"unknown act_fun {act_fun}")


def _round_up(x, m):
    return ((x + m - 1) // m) * m


# ----------------------------------------------------------------------------
# Pallas kernel: fused MLP forward over one batch tile (feature-major)
# ----------------------------------------------------------------------------
def _mlp_kernel(*refs, num_layers, act_fun, compute_dtype):
    # refs layout: x_ref, (w_ref, b_ref) * num_layers, o_ref
    x_ref = refs[0]
    o_ref = refs[-1]
    wb_refs = refs[1:-1]

    # h is (features, tile_n): batch on the lane axis (lane-dense everywhere).
    h = x_ref[...]
    for l in range(num_layers):
        w = wb_refs[2 * l][...]          # (out_l, in_l)  torch-native
        b = wb_refs[2 * l + 1][...]      # (out_l, 1)     f32, broadcasts on lanes
        h = jnp.dot(w, h, preferred_element_type=jnp.float32) + b
        if l < num_layers - 1:           # no activation after final Linear
            h = _apply_act(h, act_fun)
            # cast back to the matmul input dtype (no-op when f32)
            h = h.astype(compute_dtype)
    o_ref[...] = h.astype(o_ref.dtype)   # (out_dim, tile_n): lane-dense store


# ----------------------------------------------------------------------------
# Wrapper: builds BlockSpecs / grid and invokes pallas_call
# ----------------------------------------------------------------------------
def mlp_forward(x, weights, biases, act_fun, *, tile_n=512,
                compute_dtype=jnp.float32):
    """x: (N, in_dim) float32.
    weights: list of torch-native (out_l, in_l) arrays.
    biases:  list of (out_l,) arrays.
    compute_dtype: jnp.float32 (default) or jnp.bfloat16 for v6e/v7x MXU
                   throughput (accumulation / bias / activations stay f32).
    Returns (N, out_dim) float32.
    """
    N, in_dim = x.shape
    num_layers = len(weights)
    out_dim = weights[-1].shape[0]

    # Pick a lane-aligned batch tile and pad the batch to a multiple of it.
    tile_n = max(128, (min(tile_n, _round_up(N, 128)) // 128) * 128)
    N_pad = _round_up(N, tile_n)

    # Feature-major input: (in_dim, N_pad), batch on lanes.
    x_t = x.T
    if N_pad > N:
        x_t = jnp.pad(x_t, ((0, 0), (0, N_pad - N)))
    x_t = x_t.astype(compute_dtype)

    # Biases as (out, 1) columns so they broadcast over the lane (batch) axis.
    biases_col = [b.reshape(-1, 1).astype(jnp.float32) for b in biases]
    weights_c = [w.astype(compute_dtype) for w in weights]

    kernel = functools.partial(_mlp_kernel, num_layers=num_layers,
                               act_fun=act_fun, compute_dtype=compute_dtype)

    in_specs = [pl.BlockSpec((in_dim, tile_n), lambda i: (0, i))]
    operands = [x_t]
    for w, b in zip(weights_c, biases_col):
        in_specs.append(pl.BlockSpec(w.shape, lambda i: (0, 0)))
        in_specs.append(pl.BlockSpec(b.shape, lambda i: (0, 0)))
        operands.append(w)
        operands.append(b)

    out_spec = pl.BlockSpec((out_dim, tile_n), lambda i: (0, i))

    out_t = pl.pallas_call(
        kernel,
        out_shape=jax.ShapeDtypeStruct((out_dim, N_pad), jnp.float32),
        grid_spec=pltpu.PrefetchScalarGridSpec(
            num_scalar_prefetch=0,
            grid=(N_pad // tile_n,),
            in_specs=in_specs,
            out_specs=out_spec,
        ),
        compiler_params=pltpu.CompilerParams(
            dimension_semantics=("parallel",)),
    )(*operands)

    # Back to the PyTorch (N, out_dim) layout, dropping batch padding.
    return out_t[:, :N].T


# ----------------------------------------------------------------------------
# Deterministic parameter init (torch.nn.Linear shapes, (out, in)) + reference
# ----------------------------------------------------------------------------
def init_params(nn_layers, key):
    weights, biases = [], []
    for i in range(len(nn_layers) - 1):
        fan_in, fan_out = nn_layers[i], nn_layers[i + 1]
        key, kw, kb = jax.random.split(key, 3)
        bound = 1.0 / jnp.sqrt(fan_in)
        w = jax.random.uniform(kw, (fan_out, fan_in), jnp.float32,
                               -bound, bound)            # torch-native (out, in)
        b = jax.random.uniform(kb, (fan_out,), jnp.float32, -bound, bound)
        weights.append(w)
        biases.append(b)
    return weights, biases


def mlp_reference(x, weights, biases, act_fun):
    h = x
    n = len(weights)
    for l, (w, b) in enumerate(zip(weights, biases)):
        h = h @ w.T + b                                  # torch Linear semantics
        if l < n - 1:
            h = _apply_act(h, act_fun)
    return h


# ----------------------------------------------------------------------------
if __name__ == "__main__":
    # Net([[2, 32, 32, 32, 1], 0])  ->  tanh MLP, 2 inputs (x, t), 1 output
    nn_layers = [2, 32, 32, 32, 1]
    act_fun = 0  # tanh

    key = jax.random.PRNGKey(0)
    key, kx = jax.random.split(key)
    N = 1024                       # 2 grid steps at tile_n=512 (feeds both v7x TCs)
    x = jax.random.normal(kx, (N, nn_layers[0]), jnp.float32)

    weights, biases = init_params(nn_layers, key)

    out = mlp_forward(x, weights, biases, act_fun, tile_n=512,
                      compute_dtype=jnp.float32)
    out = jax.block_until_ready(out)

    ref = mlp_reference(x, weights, biases, act_fun)
    assert out.shape == (N, nn_layers[-1])
    assert jnp.allclose(out, ref, atol=1e-5, rtol=1e-5), (
        f"max abs err {jnp.max(jnp.abs(out - ref))}")

    # TODO(synk): for PINN training, fuse residual/loss evaluation (and the
    # backward matmuls) into the same pallas_call to amortize launch overhead.

    print("KERNEL_OK")
</pallas_src>

<mosaic_0001>
module attributes {stable_mosaic.version = 11 : i64} {
  func.func @_mlp_kernel(%arg0: i32, %arg1: memref<2x512xf32, #tpu.memory_space<vmem>>, %arg2: memref<32x2xf32, #tpu.memory_space<vmem>>, %arg3: memref<32x1xf32, #tpu.memory_space<vmem>>, %arg4: memref<32x32xf32, #tpu.memory_space<vmem>>, %arg5: memref<32x1xf32, #tpu.memory_space<vmem>>, %arg6: memref<32x32xf32, #tpu.memory_space<vmem>>, %arg7: memref<32x1xf32, #tpu.memory_space<vmem>>, %arg8: memref<1x32xf32, #tpu.memory_space<vmem>>, %arg9: memref<1x1xf32, #tpu.memory_space<vmem>>, %arg10: memref<1x512xf32, #tpu.memory_space<vmem>>) attributes {dimension_semantics = [#tpu.dimension_semantics<parallel>], iteration_bounds = array<i64: 2>, scalar_prefetch = 0 : i64, scratch_operands = 0 : i64, tpu.core_type = #tpu.core_type<tc>, window_params = [{transform_indices = @transform_0, window_bounds = array<i64: 2, 512>}, {pipeline_mode = #tpu.pipeline_mode<synchronous>, transform_indices = @transform_1, window_bounds = array<i64: 32, 2>}, {pipeline_mode = #tpu.pipeline_mode<synchronous>, transform_indices = @transform_2, window_bounds = array<i64: 32, 1>}, {pipeline_mode = #tpu.pipeline_mode<synchronous>, transform_indices = @transform_3, window_bounds = array<i64: 32, 32>}, {pipeline_mode = #tpu.pipeline_mode<synchronous>, transform_indices = @transform_4, window_bounds = array<i64: 32, 1>}, {pipeline_mode = #tpu.pipeline_mode<synchronous>, transform_indices = @transform_5, window_bounds = array<i64: 32, 32>}, {pipeline_mode = #tpu.pipeline_mode<synchronous>, transform_indices = @transform_6, window_bounds = array<i64: 32, 1>}, {pipeline_mode = #tpu.pipeline_mode<synchronous>, transform_indices = @transform_7, window_bounds = array<i64: 1, 32>}, {pipeline_mode = #tpu.pipeline_mode<synchronous>, transform_indices = @transform_8, window_bounds = array<i64: 1, 1>}, {transform_indices = @transform_9, window_bounds = array<i64: 1, 512>}]} {
    %c0 = arith.constant 0 : index
    %c0_0 = arith.constant 0 : index
    %0 = vector.load %arg1[%c0, %c0_0] : memref<2x512xf32, #tpu.memory_space<vmem>>, vector<2x512xf32>
    %c0_1 = arith.constant 0 : index
    %c0_2 = arith.constant 0 : index
    %1 = vector.load %arg2[%c0_1, %c0_2] : memref<32x2xf32, #tpu.memory_space<vmem>>, vector<32x2xf32>
    %c0_3 = arith.constant 0 : index
    %c0_4 = arith.constant 0 : index
    %2 = vector.load %arg3[%c0_3, %c0_4] : memref<32x1xf32, #tpu.memory_space<vmem>>, vector<32x1xf32>
    %cst = arith.constant dense<0.000000e+00> : vector<32x512xf32>
    %3 = tpu.matmul %1, %0, %cst {dimension_numbers = #tpu.dot_dimension_numbers<[1], [0], [0], [1], [0, 0, 1, 1], [], []>} : vector<32x2xf32>, vector<2x512xf32>, vector<32x512xf32> -> vector<32x512xf32>
    %4 = vector.broadcast %2 : vector<32x1xf32> to vector<32x512xf32>
    %5 = arith.addf %3, %4 : vector<32x512xf32>
    %6 = math.tanh %5 : vector<32x512xf32>
    %c0_5 = arith.constant 0 : index
    %c0_6 = arith.constant 0 : index
    %7 = vector.load %arg4[%c0_5, %c0_6] : memref<32x32xf32, #tpu.memory_space<vmem>>, vector<32x32xf32>
    %c0_7 = arith.constant 0 : index
    %c0_8 = arith.constant 0 : index
    %8 = vector.load %arg5[%c0_7, %c0_8] : memref<32x1xf32, #tpu.memory_space<vmem>>, vector<32x1xf32>
    %cst_9 = arith.constant dense<0.000000e+00> : vector<32x512xf32>
    %9 = tpu.matmul %7, %6, %cst_9 {dimension_numbers = #tpu.dot_dimension_numbers<[1], [0], [0], [1], [0, 0, 1, 1], [], []>} : vector<32x32xf32>, vector<32x512xf32>, vector<32x512xf32> -> vector<32x512xf32>
    %10 = vector.broadcast %8 : vector<32x1xf32> to vector<32x512xf32>
    %11 = arith.addf %9, %10 : vector<32x512xf32>
    %12 = math.tanh %11 : vector<32x512xf32>
    %c0_10 = arith.constant 0 : index
    %c0_11 = arith.constant 0 : index
    %13 = vector.load %arg6[%c0_10, %c0_11] : memref<32x32xf32, #tpu.memory_space<vmem>>, vector<32x32xf32>
    %c0_12 = arith.constant 0 : index
    %c0_13 = arith.constant 0 : index
    %14 = vector.load %arg7[%c0_12, %c0_13] : memref<32x1xf32, #tpu.memory_space<vmem>>, vector<32x1xf32>
    %cst_14 = arith.constant dense<0.000000e+00> : vector<32x512xf32>
    %15 = tpu.matmul %13, %12, %cst_14 {dimension_numbers = #tpu.dot_dimension_numbers<[1], [0], [0], [1], [0, 0, 1, 1], [], []>} : vector<32x32xf32>, vector<32x512xf32>, vector<32x512xf32> -> vector<32x512xf32>
    %16 = vector.broadcast %14 : vector<32x1xf32> to vector<32x512xf32>
    %17 = arith.addf %15, %16 : vector<32x512xf32>
    %18 = math.tanh %17 : vector<32x512xf32>
    %c0_15 = arith.constant 0 : index
    %c0_16 = arith.constant 0 : index
    %19 = vector.load %arg8[%c0_15, %c0_16] : memref<1x32xf32, #tpu.memory_space<vmem>>, vector<1x32xf32>
    %c0_17 = arith.constant 0 : index
    %c0_18 = arith.constant 0 : index
    %20 = vector.load %arg9[%c0_17, %c0_18] : memref<1x1xf32, #tpu.memory_space<vmem>>, vector<1x1xf32>
    %cst_19 = arith.constant dense<0.000000e+00> : vector<1x512xf32>
    %21 = tpu.matmul %19, %18, %cst_19 {dimension_numbers = #tpu.dot_dimension_numbers<[1], [0], [0], [1], [0, 0, 1, 1], [], []>} : vector<1x32xf32>, vector<32x512xf32>, vector<1x512xf32> -> vector<1x512xf32>
    %22 = vector.broadcast %20 : vector<1x1xf32> to vector<1x512xf32>
    %23 = arith.addf %21, %22 : vector<1x512xf32>
    %c0_20 = arith.constant 0 : index
    %c0_21 = arith.constant 0 : index
    %24 = vector.load %arg10[%c0_20, %c0_21] : memref<1x512xf32, #tpu.memory_space<vmem>>, vector<1x512xf32>
    tpu.vector_store %arg10[%c0_20, %c0_21], %23 {strides = array<i32>} : memref<1x512xf32, #tpu.memory_space<vmem>>, vector<1x512xf32>,
    return
  }
  func.func @transform_0(%arg0: i32) -> (i32, i32) {
    %c0_i32 = arith.constant 0 : i32
    %c0_i32_0 = arith.constant 0 : i32
    return %c0_i32, %arg0 : i32, i32
  }
  func.func @transform_1(%arg0: i32) -> (i32, i32) {
    %c0_i32 = arith.constant 0 : i32
    %c0_i32_0 = arith.constant 0 : i32
    %c0_i32_1 = arith.constant 0 : i32
    return %c0_i32, %c0_i32_0 : i32, i32
  }
  func.func @transform_2(%arg0: i32) -> (i32, i32) {
    %c0_i32 = arith.constant 0 : i32
    %c0_i32_0 = arith.constant 0 : i32
    %c0_i32_1 = arith.constant 0 : i32
    return %c0_i32, %c0_i32_0 : i32, i32
  }
  func.func @transform_3(%arg0: i32) -> (i32, i32) {
    %c0_i32 = arith.constant 0 : i32
    %c0_i32_0 = arith.constant 0 : i32
    %c0_i32_1 = arith.constant 0 : i32
    return %c0_i32, %c0_i32_0 : i32, i32
  }
  func.func @transform_4(%arg0: i32) -> (i32, i32) {
    %c0_i32 = arith.constant 0 : i32
    %c0_i32_0 = arith.constant 0 : i32
    %c0_i32_1 = arith.constant 0 : i32
    return %c0_i32, %c0_i32_0 : i32, i32
  }
  func.func @transform_5(%arg0: i32) -> (i32, i32) {
    %c0_i32 = arith.constant 0 : i32
    %c0_i32_0 = arith.constant 0 : i32
    %c0_i32_1 = arith.constant 0 : i32
    return %c0_i32, %c0_i32_0 : i32, i32
  }
  func.func @transform_6(%arg0: i32) -> (i32, i32) {
    %c0_i32 = arith.constant 0 : i32
    %c0_i32_0 = arith.constant 0 : i32
    %c0_i32_1 = arith.constant 0 : i32
    return %c0_i32, %c0_i32_0 : i32, i32
  }
  func.func @transform_7(%arg0: i32) -> (i32, i32) {
    %c0_i32 = arith.constant 0 : i32
    %c0_i32_0 = arith.constant 0 : i32
    %c0_i32_1 = arith.constant 0 : i32
    return %c0_i32, %c0_i32_0 : i32, i32
  }
  func.func @transform_8(%arg0: i32) -> (i32, i32) {
    %c0_i32 = arith.constant 0 : i32
    %c0_i32_0 = arith.constant 0 : i32
    %c0_i32_1 = arith.constant 0 : i32
    return %c0_i32, %c0_i32_0 : i32, i32
  }
  func.func @transform_9(%arg0: i32) -> (i32, i32) {
    %c0_i32 = arith.constant 0 : i32
    %c0_i32_0 = arith.constant 0 : i32
    return %c0_i32, %arg0 : i32, i32
  }
}

</mosaic_0001>

<bundles_post_ra>
// kernel: tpu_custom_call.1
= control target key start
LH: loop header
LB: loop body
LE: loop exit
PB: predicated region body
PF: predicated region fallthrough
CT: control target
= control target key end

     0   :  { %s1920_s0 = inlined_call_operand.vmem [shape: f32[2,1024], index: 0, kind: input, shape index: {}]   ;;  %s1921_s1 = inlined_call_operand.vmem [shape: f32[32,2], index: 1, kind: input, shape index: {}]   ;;  %s1922_s2 = inlined_call_operand.vmem [shape: f32[32,1], index: 2, kind: input, shape index: {}]   ;;  %s1923_s3 = inlined_call_operand.vmem [shape: f32[32,32], index: 3, kind: input, shape index: {}]   ;;  %s1924_s4 = inlined_call_operand.vmem [shape: f32[32,1], index: 4, kind: input, shape index: {}]   ;;  %s1925_s5 = inlined_call_operand.vmem [shape: f32[32,32], index: 5, kind: input, shape index: {}]   ;;  %s1926_s6 = inlined_call_operand.vmem [shape: f32[32,1], index: 6, kind: input, shape index: {}]   ;;  %s1927_s7 = inlined_call_operand.vmem [shape: f32[1,32], index: 7, kind: input, shape index: {}]   ;;  %s1928_s8 = inlined_call_operand.<no memory space> [shape: f32[1,1], index: 8, kind: input, shape index: {}]   ;;  %s1929_s9 = inlined_call_operand.hbm [shape: f32[1,1024], index: 9, kind: output, shape index: {}]  }
   0x1   :  { %v14_v0 = vstv %s1928_s8 }
   0x2   :  { %15 = vst [vmem:[#allocation2] sm:$0x1] %v14_v0 }
   0x3   :  { %16 = vsyncpa [#allocation4], 0 }
   0x4   :  { %18 = vsyncpa [#allocation4 + $0x1], 0  ;;  %s1687_s11 = smov 0   ;;  %s1689_s12 = smov 0  }
   0x5   :  { %s1691_s13 = smov 0   ;;  %s1693_s14 = smov 0  }
   0x6 LB: > { %s1708_s8 = sadd.s32 4294967295, %s1627_s14   ;;  %s1332_s15 = sadd.s32 4294967294, %s1627_s14   ;;  %s1627_s14 = sphi %s1693_s14, %s1935_s14   ;;  %s1623_s13 = sphi %s1691_s13, %s1934_s13   ;;  %s1619_s12 = sphi %s1689_s12, %s1933_s12   ;;  %s1615_s11 = sphi %s1687_s11, %s1932_s11  }
   0x7   : > { %s1712_s16 = sadd.s32 1, %s1627_s14   ;;  %s225_s17 = sadd.s32 1, %s1623_s13 }
   0x8   : > { %s222_s18 = ssub.s32 %s1627_s14, %s1712_s16  ;;  %p235_p0 = scmp.ne.s32.totalorder %s1623_s13, %s1619_s12 }
   0x9   : > { %p223_p1 = scmp.eq.s32.totalorder %s222_s18, 0  ;;  %p236_p2 = scmp.eq.s32.totalorder %s1708_s8, 1 }
   0xa   : > { %p241_p3 = scmp.ne.s32.totalorder %s1619_s12, %s1615_s11  ;;  %p242_p4 = scmp.eq.s32.totalorder %s1332_s15, 1 }
   0xb   : > { %s1723_s19 = scalar_select %p223_p1, %s1623_s13, %s225_s17  }
   0xc   : > { %p1725_p5 = por %p236_p2, %p235_p0  ;;  %p1729_p6 = por %p242_p4, %p241_p3 }
   0xd   : > { %p1335_p7 = scmp.ge.s32.totalorder %s1627_s14, 1  ;;  %p293_p8 = scmp.lt.s32.totalorder %s1627_s14, 3 }
   0xf   : > { %p294_p9 = pnand %p1335_p7, %p293_p8 }
  0x10   : > { %s1337_s22 = sshll.u32 (!%p294_p9), %s1708_s8, 2  ;;  %v370_v1 = vlaneseq (!%p294_p9)  ;;  %v1629_v2 = vmov (!%p294_p9), 1983009808   ;;  %v1630_v4 = vmov (!%p294_p9), 0.0   ;;  %v1631_v6 = vmov (!%p294_p9), 0   ;;  %v341_v7 = vld [vmem:[%s1922_s2] sm:$0xff] (!%p294_p9) }
  0x11   : > { %297 = sbr.rel (%p294_p9) target bundleno = 1005 (0x3ed), region = 56  ;;  %p330_p10 = scmp.lt.s32.totalorder (!%p294_p9), %s1337_s22, 7  ;;  %v368_v3 = vunpack.c.l.s4 (!%p294_p9), %v1629_v2  ;;  %469 = vmatprep.mubr.f32.mxu0 (!%p294_p9), %v1630_v4  ;;  %558 = vmatprep.mubr.f32.mxu1 (!%p294_p9), %v1630_v4  ;;  %v343_v9 = vld [vmem:[%s1922_s2 + $0x10] sm:$0xff] (!%p294_p9)  ;;  %v342_v10 = vld [vmem:[%s1922_s2 + $0x8] sm:$0xff] (!%p294_p9)  ;;  %v344_v12 = vld [vmem:[%s1922_s2 + $0x18] sm:$0xff] (!%p294_p9)  ;;  %vm396_vm0 = vcmask (!%p294_p9), 1041408  }
  0x12   : > { %v1739_v5 = vshrl.u32 (!%p294_p9), %v370_v1, 7  ;;  %1466 = vset.pattern.permute.xlu0 (!%p294_p9), %v1631_v6  ;;  %1467 = vset.pattern.permute.xlu1 (!%p294_p9), %v1631_v6  ;;  %v603_v16 = vld [vmem:[%s1924_s4] sm:$0xff] (!%p294_p9)  ;;  %v604_v17 = vld [vmem:[%s1924_s4 + $0x8] sm:$0xff] (!%p294_p9)  ;;  %vm383_vm1 = vcmask (!%p294_p9), 15360   ;;  %v605_v22 = vld [vmem:[%s1924_s4 + $0x10] sm:$0xff] (!%p294_p9)  ;;  %vm627_vm2 = vcmask (!%p294_p9), 261120  }
  0x13   : > { %v369_v8 = vunpack.c.0.s8 (!%p294_p9), %v368_v3  ;;  %347 = vperm.xlu0 (!%p294_p9), %1466, %v341_v7   ;;  %357 = vperm.xlu1 (!%p294_p9), %1467, %v343_v9   ;;  %v337_v20 = vld [vmem:[%s1921_s1] sm:$0xff] (!%p294_p9)  ;;  %v606_v23 = vld [vmem:[%s1924_s4 + $0x18] sm:$0xff] (!%p294_p9)  ;;  %v338_v24 = vld [vmem:[%s1921_s1 + $0x8] sm:$0xff] (!%p294_p9)  ;;  %s326_s25 = sand.u32 (!%p294_p9), 1, %s1619_s12   ;;  %s1374_s27 = sshll.u32 (!%p294_p9), %s1708_s8, 6  ;;  %vm1255_vm3 = vcmp.lt.s32.totalorder (!%p294_p9), %v370_v1, 512 }
  0x14   : > { %v838_v25 = vld [vmem:[%s1926_s6] sm:$0xff] (!%p294_p9)  ;;  %v839_v26 = vld [vmem:[%s1926_s6 + $0x8] sm:$0xff] (!%p294_p9)  ;;  %v339_v27 = vld [vmem:[%s1921_s1 + $0x10] sm:$0xff] (!%p294_p9)  ;;  %s1336_s26 = sshll.u32 (!%p294_p9), %s326_s25, 2  ;;  %s1878_s15 = scalar_lea.hbm (!%p294_p9), %s1929_s9, %s1374_s27 }
  0x15   : > { %v372_v11 = vsub.s32 (!%p294_p9), %v369_v8, %v1739_v5  ;;  %v840_v28 = vld [vmem:[%s1926_s6 + $0x10] sm:$0xff] (!%p294_p9)  ;;  %v841_v29 = vld [vmem:[%s1926_s6 + $0x18] sm:$0xff] (!%p294_p9)  ;;  %v1069_v31 = vld [vmem:[#allocation2] sm:$0x1] (!%p294_p9)  ;;  %s328_s28 = scalar_lea.vmem (!%p294_p9), [#allocation3], %s1336_s26  ;;  %s1259_s17 = scalar_lea.sflag (!%p294_p9), [#allocation4], %s326_s25 }
  0x16   : > { %v340_v30 = vld [vmem:[%s1921_s1 + $0x18] sm:$0xff] (!%p294_p9)  ;;  %s1633_s8 = smov (!%p294_p9), [#allocation3]  }
  0x17   : > { %352 = vperm.xlu0 (!%p294_p9), %1466, %v342_v10   ;;  %362 = vperm.xlu1 (!%p294_p9), %1467, %v344_v12   ;;  %s1569_s23 = sshll.u32 (!%p294_p9), %s1633_s8, 4  ;;  %s1570_s23 = int_to_ptr.vmem [resolvable:$false] %s1569_s23 }
  0x18   : > { %s1937_s22 = smov (!%p330_p10, %s1337_s22), 7  ;;  %s1571_s24 = scalar_lea.vmem %s1570_s23, 128 }
  0x19   : > { %s1338_s29 = sshll.u32 %s1937_s22, 1 }
  0x1a   : > { %s333_s18 = scalar_lea.vmem %s1920_s0, %s1338_s29  ;;  %s1273_s29 = sshll.u32 %s328_s28, 4  ;;  %s1880_s29 = int_to_ptr.vmem [resolvable:$true] %s1273_s29 }
  0x1b   : > { %v336_v13 = vld [vmem:[%s333_s18] sm:$0xff]  ;;  %609 = vperm.xlu0 %1466, %v603_v16   ;;  %614 = vperm.xlu1 %1467, %v604_v17   ;;  %s1565_s18 = scalar_lea.vmem %s1880_s29, 64  ;;  %p1572_p0 = scmp.lt.s32.totalorder %s1880_s29, %s1570_s23 }
  0x1c   : > { %v373_v14 = vrot.slane %v336_v13, %v372_v11  ;;  %v366_v15 = vcombine.high %v336_v13, %v336_v13  ;;  %p1566_p11 = scmp.ne.s32.totalorder %s1880_s29, %s1565_s18  ;;  %p1573_p1 = scmp.lt.s32.totalorder %s1571_s24, %s1565_s18 }
  0x1e   : > { %v381_v18 = vcombine.high %v373_v14, %v373_v14  ;;  %v380_v19 = vrot.slane %v366_v15, %v372_v11  ;;  %p1567_p12 = pnand %p1566_p11, %p1725_p5  ;;  %p1574_p2 = por %p1573_p1, %p1572_p0 }
  0x1f   : > { %619 = vperm.xlu0 %1466, %v605_v22   ;;  %624 = vperm.xlu1 %1467, %v606_v23  }
  0x20   : > { %1339 = vmatprep.subr.msk.mxu0 %vm396_vm0, %v381_v18  ;;  %v382_v21 = vcombine.high %v380_v19, %v380_v19  ;;  %p1568_p13 = pneg %p1567_p12 }
  0x21   : > { %1340 = vmatpush1.msk.msra.mxu0 %vm396_vm0, %v373_v14 }
  0x22   : > { %1341 = vmatmul.mubr.msk.f32.vlgmr.msra.gmra.mrb[0].mxu0 %vm383_vm1, %v337_v20  ;;  %1345 = vmatprep.subr.msk.mxu1 %vm396_vm0, %v382_v21  ;;  %p1575_p3 = pnand %p1574_p2, %p1568_p13 }
  0x23   : > { %1346 = vmatpush1.msk.msra.mxu1 %vm396_vm0, %v380_v19  ;;  %475 = vmatprep.mubr.f32.mxu0 %v1630_v4 }
  0x24   : > { %1347 = vmatmul.mubr.msk.f32.vlgmr.msra.gmra.mrb[0].mxu1 %vm383_vm1, %v337_v20  ;;  %844 = vperm.xlu0 %1466, %v838_v25  }
  0x25   : > { %564 = vmatprep.mubr.f32.mxu1 %v1630_v4  ;;  %849 = vperm.xlu1 %1467, %v839_v26  }
  0x26   : > { %1342 = vmatmul.mubr.msk.f32.gmra.mrb[2].mxu0 %vm383_vm1, %v338_v24 }
  0x27   : > { %481 = vmatprep.mubr.f32.mxu0 %v1630_v4 }
  0x28   : > { %1348 = vmatmul.mubr.msk.f32.gmra.mrb[2].mxu1 %vm383_vm1, %v338_v24  ;;  %854 = vperm.xlu0 %1466, %v840_v28  }
  0x29   : > { %570 = vmatprep.mubr.f32.mxu1 %v1630_v4  ;;  %859 = vperm.xlu1 %1467, %v841_v29  }
  0x2a   : > { %1343 = vmatmul.mubr.msk.f32.gmra.mrb[4].mxu0 %vm383_vm1, %v339_v27 }
  0x2b   : > { %487 = vmatprep.mubr.f32.mxu0 %v1630_v4 }
  0x2c   : > { %1349 = vmatmul.mubr.msk.f32.gmra.mrb[4].mxu1 %vm383_vm1, %v339_v27  ;;  %1072 = vperm.xlu0 %1466, %v1069_v31   ;;  %v599_v31 = vld [vmem:[%s1923_s3] sm:$0xff] }
  0x2d   : > { %576 = vmatprep.mubr.f32.mxu1 %v1630_v4 }
  0x2e   : > { %1344 = vmatmul.mubr.msk.f32.gmra.mrb[6].mxu0 %vm383_vm1, %v340_v30 }
  0x2f   : > { %704 = vmatprep.mubr.f32.mxu0 %v1630_v4 }
  0x30   : > { %1350 = vmatmul.mubr.msk.f32.gmra.mrb[6].mxu1 %vm383_vm1, %v340_v30 }
  0x31   : > { %793 = vmatprep.mubr.f32.mxu1 %v1630_v4 }
  0x92   : > { %v348_v32 = vpop.permute.xlu0 %347  ;;  %v358_v45 = vpop.permute.xlu1 %357 }
  0x96   : > { %v353_v40 = vpop.permute.xlu0 %352  ;;  %v363_v58 = vpop.permute.xlu1 %362 }
  0xf5   : > { %v471_v33 = vpop.f32.mrb[0].mxu0 }
  0xf6   : > { %v472_v34 = vadd.f32 %v471_v33, %v348_v32  ;;  %v473_v35 = vpop.f32.mrb[1].mxu0  ;;  %v601_v33 = vld [vmem:[%s1923_s3 + $0x10] sm:$0xff] }
  0xf7   : > { %v474_v36 = vadd.f32 %v473_v35, %v348_v32  ;;  %v560_v37 = vpop.f32.mrb[0].mxu1  ;;  %v610_v35 = vpop.permute.xlu0 %609 }
  0xf8   : > { %1469 = vtanh.f32 %v472_v34  ;;  %v561_v38 = vadd.f32 %v560_v37, %v348_v32  ;;  %v562_v39 = vpop.f32.mrb[1].mxu1  ;;  %v602_v34 = vld [vmem:[%s1923_s3 + $0x18] sm:$0xff] }
  0xf9   : > { %1471 = vtanh.f32 %v474_v36  ;;  %v563_v41 = vadd.f32 %v562_v39, %v348_v32  ;;  %v477_v42 = vpop.f32.mrb[2].mxu0  ;;  %v600_v32 = vld [vmem:[%s1923_s3 + $0x8] sm:$0xff] }
  0xfa   : > { %1473 = vtanh.f32 %v561_v38  ;;  %v478_v43 = vadd.f32 %v477_v42, %v353_v40  ;;  %v479_v44 = vpop.f32.mrb[3].mxu0 }
  0xfb   : > { %1475 = vtanh.f32 %v563_v41  ;;  %v480_v46 = vadd.f32 %v479_v44, %v353_v40  ;;  %v566_v47 = vpop.f32.mrb[2].mxu1 }
  0xfc   : > { %1477 = vtanh.f32 %v478_v43  ;;  %v567_v48 = vadd.f32 %v566_v47, %v353_v40  ;;  %v568_v49 = vpop.f32.mrb[3].mxu1  ;;  %v615_v43 = vpop.permute.xlu1 %614 }
  0xfd   : > { %1479 = vtanh.f32 %v480_v46  ;;  %v569_v50 = vadd.f32 %v568_v49, %v353_v40  ;;  %v483_v51 = vpop.f32.mrb[4].mxu0 }
  0xfe   : > { %1481 = vtanh.f32 %v567_v48  ;;  %v484_v52 = vadd.f32 %v483_v51, %v358_v45  ;;  %v485_v53 = vpop.f32.mrb[5].mxu0 }
  0xff   : > { %1483 = vtanh.f32 %v569_v50  ;;  %v486_v54 = vadd.f32 %v485_v53, %v358_v45  ;;  %v572_v55 = vpop.f32.mrb[4].mxu1 }
 0x100   : > { %1485 = vtanh.f32 %v484_v52  ;;  %v573_v56 = vadd.f32 %v572_v55, %v358_v45  ;;  %v574_v57 = vpop.f32.mrb[5].mxu1  ;;  %v620_v52 = vpop.permute.xlu0 %619 }
 0x101   : > { %1487 = vtanh.f32 %v486_v54  ;;  %v575_v59 = vadd.f32 %v574_v57, %v358_v45  ;;  %v489_v60 = vpop.f32.mrb[6].mxu0 }
 0x102   : > { %v1470_v61 = vpop.eup %1469  ;;  %1489 = vtanh.f32 %v573_v56  ;;  %v490_v62 = vadd.f32 %v489_v60, %v363_v58  ;;  %v491_v63 = vpop.f32.mrb[7].mxu0 }
 0x103   : > { %v1472_v0 = vpop.eup %1471  ;;  %1491 = vtanh.f32 %v575_v59  ;;  %v492_v2 = vadd.f32 %v491_v63, %v363_v58  ;;  %v578_v3 = vpop.f32.mrb[6].mxu1 }
 0x104   : > { %v1474_v6 = vpop.eup %1473  ;;  %1493 = vtanh.f32 %v490_v62  ;;  %v579_v7 = vadd.f32 %v578_v3, %v363_v58  ;;  %v580_v8 = vpop.f32.mrb[7].mxu1 }
 0x105   : > { %v1476_v9 = vpop.eup %1475  ;;  %1495 = vtanh.f32 %v492_v2  ;;  %v581_v10 = vadd.f32 %v580_v8, %v363_v58 }
 0x106   : > { %v1478_v11 = vpop.eup %1477  ;;  %1497 = vtanh.f32 %v579_v7 }
 0x107   : > { %v1480_v12 = vpop.eup %1479  ;;  %1499 = vtanh.f32 %v581_v10  ;;  %v1377_v13 = vpack.c.bf16 %v1478_v11, %v1470_v61  ;;  %v625_v61 = vpop.permute.xlu1 %624 }
 0x108   : > { %v1482_v14 = vpop.eup %1481  ;;  %v1375_v15 = vpack.c.bf16 %v1480_v12, %v1472_v0 }
 0x109   : > { %v1484_v16 = vpop.eup %1483  ;;  %v1385_v17 = vpack.c.bf16 %v1482_v14, %v1474_v6 }
 0x10a   : > { %v1486_v18 = vpop.eup %1485  ;;  %1376 = vmatprep.subr.bf16.mxu0 %v1375_v15  ;;  %v1383_v19 = vpack.c.bf16 %v1484_v16, %v1476_v9 }
 0x10b   : > { %v1488_v20 = vpop.eup %1487  ;;  %1378 = vmatpush1.bf16.msra.mxu0 %v1377_v13 }
 0x10c   : > { %v1490_v21 = vpop.eup %1489  ;;  %1384 = vmatprep.subr.bf16.mxu1 %v1383_v19 }
 0x10d   : > { %v1492_v22 = vpop.eup %1491  ;;  %1386 = vmatpush1.bf16.msra.mxu1 %v1385_v17 }
 0x10e   : > { %v1494_v23 = vpop.eup %1493 }
 0x10f   : > { %v1496_v24 = vpop.eup %1495  ;;  %v1381_v25 = vpack.c.bf16 %v1494_v23, %v1486_v18 }
 0x110   : > { %v1498_v26 = vpop.eup %1497  ;;  %v1379_v27 = vpack.c.bf16 %v1496_v24, %v1488_v20 }
 0x111   : > { %v1500_v28 = vpop.eup %1499  ;;  %v1389_v29 = vpack.c.bf16 %v1498_v26, %v1490_v21 }
 0x112   : > { %1380 = vmatprep.subr.bf16.mxu0 %v1379_v27  ;;  %v1387_v30 = vpack.c.bf16 %v1500_v28, %v1492_v22 }
 0x113   : > { %1382 = vmatpush1.bf16.msra.mxu0 %v1381_v25 }
 0x114   : > { %1388 = vmatprep.subr.bf16.mxu1 %v1387_v30 }
 0x115   : > { %1390 = vmatpush1.bf16.msra.mxu1 %v1389_v29 }
 0x116   : > { %1351 = vmatmul.mubr.msk.f32.vlgmr.msra.gmra.mrb[8].mxu0 %vm627_vm2, %v599_v31 }
 0x117   : > { %710 = vmatprep.mubr.f32.mxu0 %v1630_v4 }
 0x118   : > { %1355 = vmatmul.mubr.msk.f32.vlgmr.msra.gmra.mrb[8].mxu1 %vm627_vm2, %v599_v31 }
 0x119   : > { %799 = vmatprep.mubr.f32.mxu1 %v1630_v4 }
 0x11a   : > { %1352 = vmatmul.mubr.msk.f32.gmra.mrb[10].mxu0 %vm627_vm2, %v600_v32 }
 0x11b   : > { %716 = vmatprep.mubr.f32.mxu0 %v1630_v4 }
 0x11c   : > { %1356 = vmatmul.mubr.msk.f32.gmra.mrb[10].mxu1 %vm627_vm2, %v600_v32 }
 0x11d   : > { %805 = vmatprep.mubr.f32.mxu1 %v1630_v4 }
 0x11e   : > { %1353 = vmatmul.mubr.msk.f32.gmra.mrb[12].mxu0 %vm627_vm2, %v601_v33 }
 0x11f   : > { %722 = vmatprep.mubr.f32.mxu0 %v1630_v4 }
 0x120   : > { %1357 = vmatmul.mubr.msk.f32.gmra.mrb[12].mxu1 %vm627_vm2, %v601_v33 }
 0x121   : > { %811 = vmatprep.mubr.f32.mxu1 %v1630_v4 }
 0x122   : > { %1354 = vmatmul.mubr.msk.f32.gmra.mrb[14].mxu0 %vm627_vm2, %v602_v34 }
 0x123   : > { %938 = vmatprep.mubr.f32.mxu0 %v1630_v4 }
 0x124   : > { %1358 = vmatmul.mubr.msk.f32.gmra.mrb[14].mxu1 %vm627_vm2, %v602_v34  ;;  %v834_v34 = vld [vmem:[%s1925_s5] sm:$0xff] }
 0x125   : > { %1027 = vmatprep.mubr.f32.mxu1 %v1630_v4 }
 0x1e9   : > { %v706_v36 = vpop.f32.mrb[8].mxu0 }
 0x1ea   : > { %v707_v37 = vadd.f32 %v706_v36, %v610_v35  ;;  %v708_v38 = vpop.f32.mrb[9].mxu0  ;;  %v836_v36 = vld [vmem:[%s1925_s5 + $0x10] sm:$0xff] }
 0x1eb   : > { %v709_v39 = vadd.f32 %v708_v38, %v610_v35  ;;  %v795_v40 = vpop.f32.mrb[8].mxu1  ;;  %v845_v38 = vpop.permute.xlu0 %844 }
 0x1ec   : > { %1501 = vtanh.f32 %v707_v37  ;;  %v796_v41 = vadd.f32 %v795_v40, %v610_v35  ;;  %v797_v42 = vpop.f32.mrb[9].mxu1  ;;  %v837_v37 = vld [vmem:[%s1925_s5 + $0x18] sm:$0xff] }
 0x1ed   : > { %1503 = vtanh.f32 %v709_v39  ;;  %v798_v44 = vadd.f32 %v797_v42, %v610_v35  ;;  %v712_v45 = vpop.f32.mrb[10].mxu0  ;;  %v835_v35 = vld [vmem:[%s1925_s5 + $0x8] sm:$0xff] }
 0x1ee   : > { %1505 = vtanh.f32 %v796_v41  ;;  %v713_v46 = vadd.f32 %v712_v45, %v615_v43  ;;  %v714_v47 = vpop.f32.mrb[11].mxu0 }
 0x1ef   : > { %1507 = vtanh.f32 %v798_v44  ;;  %v715_v48 = vadd.f32 %v714_v47, %v615_v43  ;;  %v801_v49 = vpop.f32.mrb[10].mxu1 }
 0x1f0   : > { %1509 = vtanh.f32 %v713_v46  ;;  %v802_v50 = vadd.f32 %v801_v49, %v615_v43  ;;  %v803_v51 = vpop.f32.mrb[11].mxu1  ;;  %v850_v46 = vpop.permute.xlu1 %849 }
 0x1f1   : > { %1511 = vtanh.f32 %v715_v48  ;;  %v804_v53 = vadd.f32 %v803_v51, %v615_v43  ;;  %v718_v54 = vpop.f32.mrb[12].mxu0 }
 0x1f2   : > { %1513 = vtanh.f32 %v802_v50  ;;  %v719_v55 = vadd.f32 %v718_v54, %v620_v52  ;;  %v720_v56 = vpop.f32.mrb[13].mxu0  ;;  %v855_v54 = vpop.permute.xlu0 %854 }
 0x1f3   : > { %1515 = vtanh.f32 %v804_v53  ;;  %v721_v57 = vadd.f32 %v720_v56, %v620_v52  ;;  %v807_v58 = vpop.f32.mrb[12].mxu1 }
 0x1f4   : > { %1517 = vtanh.f32 %v719_v55  ;;  %v808_v59 = vadd.f32 %v807_v58, %v620_v52  ;;  %v809_v60 = vpop.f32.mrb[13].mxu1 }
 0x1f5   : > { %1519 = vtanh.f32 %v721_v57  ;;  %v810_v62 = vadd.f32 %v809_v60, %v620_v52  ;;  %v724_v63 = vpop.f32.mrb[14].mxu0 }
 0x1f6   : > { %v1502_v0 = vpop.eup %1501  ;;  %1521 = vtanh.f32 %v808_v59  ;;  %v725_v2 = vadd.f32 %v724_v63, %v625_v61  ;;  %v726_v3 = vpop.f32.mrb[15].mxu0 }
 0x1f7   : > { %v1504_v6 = vpop.eup %1503  ;;  %1523 = vtanh.f32 %v810_v62  ;;  %v727_v7 = vadd.f32 %v726_v3, %v625_v61  ;;  %v813_v8 = vpop.f32.mrb[14].mxu1 }
 0x1f8   : > { %v1506_v9 = vpop.eup %1505  ;;  %1525 = vtanh.f32 %v725_v2  ;;  %v814_v10 = vadd.f32 %v813_v8, %v625_v61  ;;  %v815_v11 = vpop.f32.mrb[15].mxu1 }
 0x1f9   : > { %v1508_v12 = vpop.eup %1507  ;;  %1527 = vtanh.f32 %v727_v7  ;;  %v816_v13 = vadd.f32 %v815_v11, %v625_v61  ;;  %v860_v63 = vpop.permute.xlu1 %859 }
 0x1fa   : > { %v1510_v14 = vpop.eup %1509  ;;  %1529 = vtanh.f32 %v814_v10 }
 0x1fb   : > { %v1512_v15 = vpop.eup %1511  ;;  %1531 = vtanh.f32 %v816_v13  ;;  %v1393_v16 = vpack.c.bf16 %v1510_v14, %v1502_v0 }
 0x1fc   : > { %v1514_v17 = vpop.eup %1513  ;;  %v1391_v18 = vpack.c.bf16 %v1512_v15, %v1504_v6 }
 0x1fd   : > { %v1516_v19 = vpop.eup %1515  ;;  %v1401_v20 = vpack.c.bf16 %v1514_v17, %v1506_v9 }
 0x1fe   : > { %v1518_v21 = vpop.eup %1517  ;;  %1392 = vmatprep.subr.bf16.mxu0 %v1391_v18  ;;  %v1399_v22 = vpack.c.bf16 %v1516_v19, %v1508_v12 }
 0x1ff   : > { %v1520_v23 = vpop.eup %1519  ;;  %1394 = vmatpush1.bf16.msra.mxu0 %v1393_v16 }
 0x200   : > { %v1522_v24 = vpop.eup %1521  ;;  %1400 = vmatprep.subr.bf16.mxu1 %v1399_v22 }
 0x201   : > { %v1524_v25 = vpop.eup %1523  ;;  %1402 = vmatpush1.bf16.msra.mxu1 %v1401_v20 }
 0x202   : > { %v1526_v26 = vpop.eup %1525 }
 0x203   : > { %v1528_v27 = vpop.eup %1527  ;;  %v1397_v28 = vpack.c.bf16 %v1526_v26, %v1518_v21 }
 0x204   : > { %v1530_v29 = vpop.eup %1529  ;;  %v1395_v30 = vpack.c.bf16 %v1528_v27, %v1520_v23 }
 0x205   : > { %v1532_v31 = vpop.eup %1531  ;;  %v1405_v32 = vpack.c.bf16 %v1530_v29, %v1522_v24 }
 0x206   : > { %1396 = vmatprep.subr.bf16.mxu0 %v1395_v30  ;;  %v1403_v33 = vpack.c.bf16 %v1532_v31, %v1524_v25 }
 0x207   : > { %1398 = vmatpush1.bf16.msra.mxu0 %v1397_v28 }
 0x208   : > { %1404 = vmatprep.subr.bf16.mxu1 %v1403_v33 }
 0x209   : > { %1406 = vmatpush1.bf16.msra.mxu1 %v1405_v32 }
 0x20a   : > { %1359 = vmatmul.mubr.msk.f32.vlgmr.msra.gmra.mrb[16].mxu0 %vm627_vm2, %v834_v34 }
 0x20b   : > { %944 = vmatprep.mubr.f32.mxu0 %v1630_v4 }
 0x20c   : > { %1363 = vmatmul.mubr.msk.f32.vlgmr.msra.gmra.mrb[16].mxu1 %vm627_vm2, %v834_v34 }
 0x20d   : > { %1033 = vmatprep.mubr.f32.mxu1 %v1630_v4 }
 0x20e   : > { %1360 = vmatmul.mubr.msk.f32.gmra.mrb[18].mxu0 %vm627_vm2, %v835_v35 }
 0x20f   : > { %950 = vmatprep.mubr.f32.mxu0 %v1630_v4 }
 0x210   : > { %1364 = vmatmul.mubr.msk.f32.gmra.mrb[18].mxu1 %vm627_vm2, %v835_v35 }
 0x211   : > { %1039 = vmatprep.mubr.f32.mxu1 %v1630_v4 }
 0x212   : > { %1361 = vmatmul.mubr.msk.f32.gmra.mrb[20].mxu0 %vm627_vm2, %v836_v36 }
 0x213   : > { %956 = vmatprep.mubr.f32.mxu0 %v1630_v4 }
 0x214   : > { %1365 = vmatmul.mubr.msk.f32.gmra.mrb[20].mxu1 %vm627_vm2, %v836_v36  ;;  %v1068_v36 = vld [vmem:[%s1927_s7] sm:$0x1] }
 0x215   : > { %1045 = vmatprep.mubr.f32.mxu1 %v1630_v4 }
 0x216   : > { %1362 = vmatmul.mubr.msk.f32.gmra.mrb[22].mxu0 %vm627_vm2, %v837_v37 }
 0x217   : > { %1146 = vmatprep.mubr.f32.mxu0 %v1630_v4 }
 0x218   : > { %1366 = vmatmul.mubr.msk.f32.gmra.mrb[22].mxu1 %vm627_vm2, %v837_v37  ;;  %v1077_v37 = vsub.s32 0, %v1739_v5 }
 0x219   : > { %1217 = vmatprep.mubr.f32.mxu1 %v1630_v4 }
 0x2dd   : > { %v940_v39 = vpop.f32.mrb[16].mxu0 }
 0x2de   : > { %v941_v40 = vadd.f32 %v940_v39, %v845_v38  ;;  %v942_v41 = vpop.f32.mrb[17].mxu0  ;;  %v1632_v39 = vmov 1966171168  }
 0x2df   : > { %v943_v42 = vadd.f32 %v942_v41, %v845_v38  ;;  %v1029_v43 = vpop.f32.mrb[16].mxu1 }
 0x2e0   : > { %1533 = vtanh.f32 %v941_v40  ;;  %v1030_v44 = vadd.f32 %v1029_v43, %v845_v38  ;;  %v1031_v45 = vpop.f32.mrb[17].mxu1  ;;  %v1231_v40 = vunpack.c.l.s4 %v1632_v39 }
 0x2e1   : > { %1535 = vtanh.f32 %v943_v42  ;;  %v1032_v47 = vadd.f32 %v1031_v45, %v845_v38  ;;  %v946_v48 = vpop.f32.mrb[18].mxu0  ;;  %v1073_v38 = vpop.permute.xlu0 %1072 }
 0x2e2   : > { %1537 = vtanh.f32 %v1030_v44  ;;  %v947_v49 = vadd.f32 %v946_v48, %v850_v46  ;;  %v948_v50 = vpop.f32.mrb[19].mxu0  ;;  %v1078_v41 = vrot.slane %v1073_v38, %v1077_v37  ;;  %v1232_v43 = vunpack.c.0.s8 %v1231_v40 }
 0x2e3   : > { %1539 = vtanh.f32 %v1032_v47  ;;  %v949_v51 = vadd.f32 %v948_v50, %v850_v46  ;;  %v1035_v52 = vpop.f32.mrb[18].mxu1 }
 0x2e4   : > { %1541 = vtanh.f32 %v947_v49  ;;  %v1036_v4 = vadd.f32 %v1035_v52, %v850_v46  ;;  %v1037_v53 = vpop.f32.mrb[19].mxu1 }
 0x2e5   : > { %1543 = vtanh.f32 %v949_v51  ;;  %v1038_v55 = vadd.f32 %v1037_v53, %v850_v46  ;;  %v952_v56 = vpop.f32.mrb[20].mxu0  ;;  %v1235_v51 = vsub.s32 %v1232_v43, %v1739_v5 }
 0x2e6   : > { %1545 = vtanh.f32 %v1036_v4  ;;  %v953_v57 = vadd.f32 %v952_v56, %v855_v54  ;;  %v954_v58 = vpop.f32.mrb[21].mxu0 }
 0x2e7   : > { %1547 = vtanh.f32 %v1038_v55  ;;  %v955_v59 = vadd.f32 %v954_v58, %v855_v54  ;;  %v1041_v60 = vpop.f32.mrb[20].mxu1 }
 0x2e8   : > { %1549 = vtanh.f32 %v953_v57  ;;  %v1042_v61 = vadd.f32 %v1041_v60, %v855_v54  ;;  %v1043_v62 = vpop.f32.mrb[21].mxu1 }
 0x2e9   : > { %1551 = vtanh.f32 %v955_v59  ;;  %v1044_v0 = vadd.f32 %v1043_v62, %v855_v54  ;;  %v958_v2 = vpop.f32.mrb[22].mxu0 }
 0x2ea   : > { %v1534_v3 = vpop.eup %1533  ;;  %1553 = vtanh.f32 %v1042_v61  ;;  %v959_v6 = vadd.f32 %v958_v2, %v860_v63  ;;  %v960_v7 = vpop.f32.mrb[23].mxu0 }
 0x2eb   : > { %v1536_v8 = vpop.eup %1535  ;;  %1555 = vtanh.f32 %v1044_v0  ;;  %v961_v9 = vadd.f32 %v960_v7, %v860_v63  ;;  %v1047_v10 = vpop.f32.mrb[22].mxu1 }
 0x2ec   : > { %v1538_v11 = vpop.eup %1537  ;;  %1557 = vtanh.f32 %v959_v6  ;;  %v1048_v12 = vadd.f32 %v1047_v10, %v860_v63  ;;  %v1049_v13 = vpop.f32.mrb[23].mxu1 }
 0x2ed   : > { %v1540_v14 = vpop.eup %1539  ;;  %1559 = vtanh.f32 %v961_v9  ;;  %v1050_v15 = vadd.f32 %v1049_v13, %v860_v63 }
 0x2ee   : > { %v1542_v16 = vpop.eup %1541  ;;  %1561 = vtanh.f32 %v1048_v12 }
 0x2ef   : > { %v1544_v17 = vpop.eup %1543  ;;  %1563 = vtanh.f32 %v1050_v15  ;;  %v1409_v18 = vpack.c.bf16 %v1542_v16, %v1534_v3 }
 0x2f0   : > { %v1546_v19 = vpop.eup %1545  ;;  %v1407_v20 = vpack.c.bf16 %v1544_v17, %v1536_v8 }
 0x2f1   : > { %v1548_v21 = vpop.eup %1547  ;;  %v1417_v22 = vpack.c.bf16 %v1546_v19, %v1538_v11 }
 0x2f2   : > { %v1550_v23 = vpop.eup %1549  ;;  %1408 = vmatprep.subr.bf16.mxu0 %v1407_v20  ;;  %v1415_v24 = vpack.c.bf16 %v1548_v21, %v1540_v14 }
 0x2f3   : > { %v1552_v25 = vpop.eup %1551  ;;  %1410 = vmatpush1.bf16.msra.mxu0 %v1409_v18 }
 0x2f4   : > { %v1554_v26 = vpop.eup %1553  ;;  %1416 = vmatprep.subr.bf16.mxu1 %v1415_v24 }
 0x2f5   : > { %v1556_v27 = vpop.eup %1555  ;;  %1418 = vmatpush1.bf16.msra.mxu1 %v1417_v22 }
 0x2f6   : > { %v1558_v28 = vpop.eup %1557 }
 0x2f7   : > { %v1560_v29 = vpop.eup %1559  ;;  %v1413_v30 = vpack.c.bf16 %v1558_v28, %v1550_v23 }
 0x2f8   : > { %v1562_v31 = vpop.eup %1561  ;;  %v1411_v32 = vpack.c.bf16 %v1560_v29, %v1552_v25 }
 0x2f9   : > { %v1564_v33 = vpop.eup %1563  ;;  %v1421_v34 = vpack.c.bf16 %v1562_v31, %v1554_v26 }
 0x2fa   : > { %1412 = vmatprep.subr.bf16.mxu0 %v1411_v32  ;;  %v1419_v35 = vpack.c.bf16 %v1564_v33, %v1556_v27 }
 0x2fb   : > { %1414 = vmatpush1.bf16.msra.mxu0 %v1413_v30 }
 0x2fc   : > { %1420 = vmatprep.subr.bf16.mxu1 %v1419_v35 }
 0x2fd   : > { %1422 = vmatpush1.bf16.msra.mxu1 %v1421_v34 }
 0x2fe   : > { %1367 = vmatmul.mubr.msk.f32.vlgmr.msra.gmra.mrb[24].mxu0 %vm627_vm2, %v1068_v36 }
 0x300   : > { %1368 = vmatmul.mubr.msk.f32.vlgmr.msra.gmra.mrb[24].mxu1 %vm627_vm2, %v1068_v36 }
 0x3d1   : > { %v1148_v42 = vpop.f32.mrb[24].mxu0 }
 0x3d2   : > { %v1149_v44 = vadd.f32 %v1148_v42, %v1078_v41  ;;  %v1150_v45 = vpop.f32.mrb[25].mxu0 }
 0x3d3   : > { %v1151_v46 = vadd.f32 %v1150_v45, %v1078_v41  ;;  %v1219_v47 = vpop.f32.mrb[24].mxu1 }
 0x3d4   : > { %v1220_v48 = vadd.f32 %v1219_v47, %v1078_v41  ;;  %v1221_v49 = vpop.f32.mrb[25].mxu1 }
 0x3d5   : > { %v1228_v50 = vcombine.low %v1149_v44, %v1151_v46  ;;  %v1222_v52 = vadd.f32 %v1221_v49, %v1078_v41 }
 0x3d7   : > { %v1229_v4 = vcombine.low %v1220_v48, %v1222_v52  ;;  %v1236_v53 = vrot.slane %v1228_v50, %v1235_v51 }
 0x3d9   : > { %v1243_v54 = vrot.slane %v1229_v4, %v1235_v51 }
 0x3db   : > { %v1244_v55 = vcombine.low %v1236_v53, %v1243_v54 }
 0x3dd   : > { %v1251_v56 = vrot.slane %v1244_v55, %v1235_v51 }
 0x3df   : > { %1257 = vst.msk [vmem:[%s328_s28] sm:$0xf] %vm1255_vm3, %v1251_v56 }
 0x3e0   : > { %1578 = shalt.err (!%p1575_p3)
}
 0x3e1   : > { %s1579_s22 = scalar_lea.hbm %s1878_s15, 64  ;;  %s1583_s27 = scalar_lea.hbm %s1929_s9, 128 }
 0x3e2   : > { %p1580_p4 = scmp.ne.s32.totalorder %s1878_s15, %s1579_s22  ;;  %p1584_p9 = scmp.lt.u32.totalorder %s1878_s15, %s1929_s9 }
 0x3e3   : > { %p1585_p10 = scmp.lt.u32.totalorder %s1583_s27, %s1579_s22  ;;  %p1587_p12 = scmp.lt.u32.totalorder %s1579_s22, %s1878_s15 }
 0x3e4   : > { %p1581_p7 = pnand %p1580_p4, %p1725_p5 }
 0x3e5   : > { %p1586_p11 = por %p1585_p10, %p1584_p9 }
 0x3e6   : > { %p1582_p8 = pneg %p1581_p7 }
 0x3e7   : > { %p1588_p13 = por %p1587_p12, %p1586_p11 }
 0x3e9   : > { %p1589_p0 = pnand %p1588_p13, %p1582_p8 }
 0x3eb   : > { %1592 = shalt.err (!%p1589_p0)
}
 0x3ec   : > { %1423 = dma.vmem_to_hbm [thread:$0]  (%p1725_p5), %s1880_s29, 64, %s1878_s15, %s1259_s17  }
 0x3ed PF: > { %p1429_p1 = scmp.ge.s32.totalorder %s1627_s14, 2  ;;  %s1285_s10 = sand.u32 1, %s1615_s11  }
 0x3ee   : > { %s1286_s18 = scalar_lea.sflag [#allocation4], %s1285_s10 }
 0x3ef   : > { %p1426_p2 = pnand %p1429_p1, %p1729_p6 }
 0x3f1   : > { %1610 = dma.done.wait (!%p1426_p2), %s1286_s18, 64  }
 0x3f2   : > { %1612 = vsyncadd (!%p1426_p2), %s1286_s18, 4294967232  ;;  %p21_p3 = scmp.ge.s32.totalorder %s1712_s16, 4   ;;  %s1932_s11 = smov %s1619_s12 }
 0x3f3   : > { %s1933_s12 = smov %s1623_s13  ;;  %s1934_s13 = smov %s1723_s19 }
 0x3f4   : > { %s1935_s14 = smov %s1712_s16  ;;  %23 = sbr.rel (!%p21_p3) target bundleno = 6 (0x6), region = 91 }
 0x3fb   :  { %1291 = vsyncpa [#allocation4], 1 }
 0x3fc   :  { %1293 = vsyncpa [#allocation4 + $0x1], 1 }

</bundles_post_ra>
